<compile_context>
chip_gen: v6e
topology: v6e:2x2x1
jax: 0.10.0
libtpu: 0.0.40
codegen_flags: <defaults>
</compile_context>

<pallas_src>
import functools
import math

import numpy as np
import jax
import jax.numpy as jnp
from jax.experimental import pallas as pl
from jax.experimental.pallas import tpu as pltpu


# ----------------------------------------------------------------------------
# Fused whole-network kernel (one grid step == one batch element).
# Activation layout: rows = H (sublanes), cols = W*C (lanes), column = w*C + c.
# ----------------------------------------------------------------------------
def _ednet_fused_kernel(*refs, stage_hs, num_linear):
    o_ref = refs[-1]
    idx = 0
    x = refs[idx][...]                 # stage-1 padded input: (H+2, (W+2)*Cin)
    idx += 1

    # ---- Encoder stages: Conv3x3(pad=1) + bias + ReLU + MaxPool2d(3) ----
    for H in stage_hs:
        bw, brow, srp, sccat = refs[idx], refs[idx + 1], refs[idx + 2], refs[idx + 3]
        idx += 4
        # 3x3 conv as 3 banded matmuls (one per kernel row), f32 accumulation.
        acc = jnp.dot(x[0:H, :], bw[0], preferred_element_type=jnp.float32)
        acc = acc + jnp.dot(x[1:H + 1, :], bw[1], preferred_element_type=jnp.float32)
        acc = acc + jnp.dot(x[2:H + 2, :], bw[2], preferred_element_type=jnp.float32)
        y = jnp.maximum(acc + brow[...], 0.0)                       # (H, W*Cout)
        # MaxPool2d(3), stride 3, floor:
        #   1) sliding 3-row max (static sublane slices)
        m = jnp.maximum(jnp.maximum(y[0:H - 2, :], y[1:H - 1, :]), y[2:H, :])
        #   2) row subsample (plus the NEXT stage's zero pad rows) via 0/1 matmul
        rsub = jnp.dot(srp[...], m, preferred_element_type=jnp.float32)
        #   3) ONE concatenated column-select matmul: the 3 pw offsets land in 3
        #      lane slabs, maxed elementwise.  All-zero selector columns realize
        #      the next stage's zero column padding for free.
        pcat = jnp.dot(rsub, sccat[...], preferred_element_type=jnp.float32)
        ws = pcat.shape[-1] // 3
        x = jnp.maximum(jnp.maximum(pcat[:, 0:ws], pcat[:, ws:2 * ws]),
                        pcat[:, 2 * ws:3 * ws])
        # x is now the next stage's (already padded) input, or the final pooled map.

    # ---- Decoder: (Linear -> Sigmoid)* + final Linear, all in vregs ----
    # First linear: PyTorch's (c,h,w) flatten is folded into a row-permuted weight
    # reshaped to (H_last, W_last*C_last, fout); contract each activation row with
    # its weight row-block (avoids an in-kernel reshape across sublanes).
    w1, b1 = refs[idx], refs[idx + 1]
    idx += 2
    h = b1[...]
    for r in range(w1.shape[0]):
        h = h + jnp.dot(x[r:r + 1, :], w1[r], preferred_element_type=jnp.float32)
    if num_linear > 1:
        h = jax.nn.sigmoid(h)
    for li in range(1, num_linear):
        w, b = refs[idx], refs[idx + 1]
        idx += 2
        h = jnp.dot(h, w[...], preferred_element_type=jnp.float32) + b[...]
        if li < num_linear - 1:
            h = jax.nn.sigmoid(h)
    o_ref[...] = h.astype(o_ref.dtype)


# ----------------------------------------------------------------------------
# BlockSpec helpers
# ----------------------------------------------------------------------------
def _const_index_map(ndim):
    zeros = (0,) * ndim

    def imap(n):
        return zeros

    return imap


def _const_spec(arr):
    """Full-array, VMEM-resident block with a constant index map."""
    return pl.BlockSpec(arr.shape, _const_index_map(arr.ndim))


# ----------------------------------------------------------------------------
# Forward pass: one pallas_call for the entire network.
# ----------------------------------------------------------------------------
def ednet_forward(x_nchw, prep):
    N, Cin, H, W = x_nchw.shape
    consts = prep["consts"]
    num_labels = prep["num_labels"]

    # Mandatory entry relayout: NCHW -> row-packed NHWC (N, H, W*C) + stage-1 conv
    # zero padding.  XLA fuses transpose/reshape/pad into a single copy.
    xp = jnp.pad(jnp.transpose(x_nchw, (0, 2, 3, 1)).reshape(N, H, W * Cin),
                 ((0, 0), (1, 1), (Cin, Cin)))

    kernel = functools.partial(_ednet_fused_kernel,
                               stage_hs=prep["stage_hs"],
                               num_linear=prep["num_linear"])

    in_specs = [pl.BlockSpec((None, H + 2, (W + 2) * Cin), lambda n: (n, 0, 0))]
    in_specs += [_const_spec(a) for a in consts]

    cost = pl.CostEstimate(
        flops=int(N * prep["flops_per_sample"]),
        transcendentals=int(N * prep["trans_per_sample"]),
        bytes_accessed=int(4 * (xp.size + sum(a.size for a in consts)
                                + N * num_labels)))

    out = pl.pallas_call(
        kernel,
        out_shape=jax.ShapeDtypeStruct((N, 1, num_labels), jnp.float32),
        grid=(N,),
        in_specs=in_specs,
        out_specs=pl.BlockSpec((None, 1, num_labels), lambda n: (n, 0, 0)),
        compiler_params=pltpu.CompilerParams(
            # One full batch element per TensorCore on v7x; plain serial loop on
            # v5e/v6e.  With a single sample there is nothing to shard.
            dimension_semantics=("parallel",) if N > 1 else ("arbitrary",)),
        cost_estimate=cost,
    )(xp, *consts)
    return out.reshape(N, num_labels)


# ----------------------------------------------------------------------------
# One-time parameter preparation (host-side, outside the forward pass)
# ----------------------------------------------------------------------------
def make_banded_conv_weights(weight_oihw, W):
    """(Cout, Cin, 3, 3) -> (3, (W+2)*Cin, W*Cout): one banded matrix per kernel row.
    BW[kh, (w+kw)*Cin + cin, w*Cout + co] = weight[co, cin, kh, kw]."""
    w_np = np.asarray(weight_oihw)
    Cout, Cin, KH, KW = w_np.shape
    bw = np.zeros((KH, (W + 2) * Cin, W * Cout), np.float32)
    for kh in range(KH):
        for kw in range(KW):
            blk = w_np[:, :, kh, kw].T                          # (Cin, Cout)
            for w in range(W):
                bw[kh, (w + kw) * Cin:(w + kw) * Cin + Cin,
                   w * Cout:w * Cout + Cout] = blk
    return jnp.asarray(bw)


def make_pool_selectors(H, W, C, pad):
    """Row-subsample (Ho+2*pad, H-2) and concatenated column-select
    (W*C, 3*(Wo+2*pad)*C) 0/1 matrices.  With pad=1, the all-zero border
    rows/columns realize the NEXT stage's conv zero padding for free."""
    Ho, Wo = H // 3, W // 3
    sr = np.zeros((Ho + 2 * pad, H - 2), np.float32)
    sr[pad + np.arange(Ho), 3 * np.arange(Ho)] = 1.0
    slab = (Wo + 2 * pad) * C
    sc = np.zeros((W * C, 3 * slab), np.float32)
    for pw in range(3):
        for wo in range(Wo):
            for c in range(C):
                sc[(3 * wo + pw) * C + c, pw * slab + (pad + wo) * C + c] = 1.0
    return jnp.asarray(sr), jnp.asarray(sc)


def make_flatten_permuted_w1(w1, C, Ho, Wo):
    """Reorder rows of the first decoder weight so the encoder's (h, w, c)-ordered
    flatten matches PyTorch's NCHW (c, h, w) flatten ordering."""
    F = C * Ho * Wo
    idx = np.arange(F).reshape(C, Ho, Wo)                       # torch index at (c,h,w)
    perm = np.transpose(idx, (1, 2, 0)).reshape(F)              # our position -> torch idx
    return np.asarray(w1)[perm, :]


def prepare_params(params, in_hw, in_channels, encoder_channels):
    H, W = in_hw
    chans = [in_channels, *encoder_channels]
    n_stages = len(encoder_channels)
    consts, stage_hs = [], []
    flops, trans = 0, 0
    h, w = H, W
    for si, ((wt, b), cin, cout) in enumerate(zip(params["conv"], chans, chans[1:])):
        assert h >= 3 and w >= 3, "encoder assumes H, W >= 3 (floor-mode pooling)"
        bw = make_banded_conv_weights(wt, w)
        brow = jnp.tile(b, w).reshape(1, w * cout)              # col w*Cout+co -> b[co]
        pad = 1 if si < n_stages - 1 else 0                     # pad rows/cols for next conv
        sr, sc = make_pool_selectors(h, w, cout, pad)
        consts += [bw, brow, sr, sc]
        stage_hs.append(h)
        flops += 3 * 2 * h * ((w + 2) * cin) * (w * cout)       # conv matmuls
        flops += 2 * sr.shape[0] * (h - 2) * (w * cout)         # row-subsample matmul
        flops += 2 * sr.shape[0] * (w * cout) * sc.shape[1]     # column-select matmul
        h, w = h // 3, w // 3

    c_last = chans[-1]
    flat = c_last * h * w
    all_lin = list(params["dec"]) + [params["last"]]
    assert all_lin[0][0].shape[0] == flat, (
        "flatten size (C*H*W after encoder) must equal decoder_features[0]")
    f1 = all_lin[0][0].shape[1]
    w1p = make_flatten_permuted_w1(all_lin[0][0], c_last, h, w)
    w1_3d = jnp.asarray(w1p.reshape(h, w * c_last, f1))         # (H_last, W_last*C_last, f1)
    consts += [w1_3d, all_lin[0][1].reshape(1, -1)]
    flops += 2 * flat * f1
    for (wl, bl) in all_lin[1:]:
        consts += [wl, bl.reshape(1, -1)]
        flops += 2 * wl.shape[0] * wl.shape[1]
    trans += sum(int(lin[0].shape[1]) for lin in all_lin[:-1])  # sigmoid exps per sample

    return dict(consts=consts, stage_hs=tuple(stage_hs),
                num_linear=len(all_lin), num_labels=int(all_lin[-1][0].shape[1]),
                flops_per_sample=flops, trans_per_sample=trans)


# ----------------------------------------------------------------------------
# Deterministic parameter initialization (PyTorch-style uniform fan-in bounds)
# ----------------------------------------------------------------------------
def init_conv(key, cin, cout):
    kw, kb = jax.random.split(key)
    bound = 1.0 / math.sqrt(cin * 9)
    w = jax.random.uniform(kw, (cout, cin, 3, 3), jnp.float32, -bound, bound)
    b = jax.random.uniform(kb, (cout,), jnp.float32, -bound, bound)
    return w, b


def init_linear(key, fin, fout):
    kw, kb = jax.random.split(key)
    bound = 1.0 / math.sqrt(fin)
    w = jax.random.uniform(kw, (fin, fout), jnp.float32, -bound, bound)
    b = jax.random.uniform(kb, (fout,), jnp.float32, -bound, bound)
    return w, b


# ----------------------------------------------------------------------------
# Pure-JAX reference (uses the original, untransformed parameters)
# ----------------------------------------------------------------------------
def ednet_reference(x_nchw, params):
    x = x_nchw
    for (w, b) in params["conv"]:
        y = jax.lax.conv_general_dilated(
            x, w, window_strides=(1, 1), padding=((1, 1), (1, 1)),
            dimension_numbers=("NCHW", "OIHW", "NCHW"))
        y = jax.nn.relu(y + b[None, :, None, None])
        x = jax.lax.reduce_window(
            y, -jnp.inf, jax.lax.max,
            window_dimensions=(1, 1, 3, 3), window_strides=(1, 1, 3, 3),
            padding="VALID")
    N = x.shape[0]
    x = x.reshape(N, -1)
    for (w, b) in params["dec"]:
        x = jax.nn.sigmoid(x @ w + b)
    w, b = params["last"]
    return x @ w + b


if __name__ == "__main__":
    # Config: EDNet(in_channels=3, encoder_channels=(4, 8),
    #               decoder_features=(32, 16), num_labels=5)
    # Input 18x18 -> conv/pool -> 6x6 -> conv/pool -> 2x2; flatten = 8*2*2 = 32
    batch, in_channels, H, W = 2, 3, 18, 18
    encoder_channels = (4, 8)
    decoder_features = (32, 16)
    num_labels = 5

    key = jax.random.PRNGKey(0)
    keys = jax.random.split(key, 8)

    chans = [in_channels, *encoder_channels]
    conv_params = [init_conv(keys[i], cin, cout)
                   for i, (cin, cout) in enumerate(zip(chans, chans[1:]))]
    dec_params = [init_linear(keys[4 + i], fin, fout)
                  for i, (fin, fout) in
                  enumerate(zip(decoder_features, decoder_features[1:]))]
    last_params = init_linear(keys[7], decoder_features[-1], num_labels)
    params = {"conv": conv_params, "dec": dec_params, "last": last_params}

    x = jax.random.normal(keys[3], (batch, in_channels, H, W), jnp.float32)

    # Precompute kernel-format parameters once (banded conv weights, padded pooling
    # selectors, flatten-permuted 3-D first decoder weight).
    prep = prepare_params(params, (H, W), in_channels, encoder_channels)

    forward = jax.jit(lambda xin: ednet_forward(xin, prep))
    out = jax.block_until_ready(forward(x))

    ref = jax.block_until_ready(ednet_reference(x, params))
    assert out.shape == (batch, num_labels)
    assert jnp.allclose(out, ref, atol=1e-4, rtol=1e-4)

    print("KERNEL_OK")
</pallas_src>

<mosaic_0001>
module attributes {stable_mosaic.version = 11 : i64} {
  func.func @_ednet_fused_kernel(%arg0: i32, %arg1: memref<1x20x60xf32, #tpu.memory_space<vmem>>, %arg2: memref<3x60x72xf32, #tpu.memory_space<vmem>>, %arg3: memref<1x72xf32, #tpu.memory_space<vmem>>, %arg4: memref<8x16xf32, #tpu.memory_space<vmem>>, %arg5: memref<72x96xf32, #tpu.memory_space<vmem>>, %arg6: memref<3x32x48xf32, #tpu.memory_space<vmem>>, %arg7: memref<1x48xf32, #tpu.memory_space<vmem>>, %arg8: memref<2x4xf32, #tpu.memory_space<vmem>>, %arg9: memref<48x48xf32, #tpu.memory_space<vmem>>, %arg10: memref<2x16x16xf32, #tpu.memory_space<vmem>>, %arg11: memref<1x16xf32, #tpu.memory_space<vmem>>, %arg12: memref<16x5xf32, #tpu.memory_space<vmem>>, %arg13: memref<1x5xf32, #tpu.memory_space<vmem>>, %arg14: memref<1x1x5xf32, #tpu.memory_space<vmem>>) attributes {dimension_semantics = [#tpu.dimension_semantics<parallel>], iteration_bounds = array<i64: 2>, scalar_prefetch = 0 : i64, scratch_operands = 0 : i64, tpu.core_type = #tpu.core_type<tc>, window_params = [{transform_indices = @transform_0, window_bounds = array<i64: 1, 20, 60>}, {pipeline_mode = #tpu.pipeline_mode<synchronous>, transform_indices = @transform_1, window_bounds = array<i64: 3, 60, 72>}, {pipeline_mode = #tpu.pipeline_mode<synchronous>, transform_indices = @transform_2, window_bounds = array<i64: 1, 72>}, {pipeline_mode = #tpu.pipeline_mode<synchronous>, transform_indices = @transform_3, window_bounds = array<i64: 8, 16>}, {pipeline_mode = #tpu.pipeline_mode<synchronous>, transform_indices = @transform_4, window_bounds = array<i64: 72, 96>}, {pipeline_mode = #tpu.pipeline_mode<synchronous>, transform_indices = @transform_5, window_bounds = array<i64: 3, 32, 48>}, {pipeline_mode = #tpu.pipeline_mode<synchronous>, transform_indices = @transform_6, window_bounds = array<i64: 1, 48>}, {pipeline_mode = #tpu.pipeline_mode<synchronous>, transform_indices = @transform_7, window_bounds = array<i64: 2, 4>}, {pipeline_mode = #tpu.pipeline_mode<synchronous>, transform_indices = @transform_8, window_bounds = array<i64: 48, 48>}, {pipeline_mode = #tpu.pipeline_mode<synchronous>, transform_indices = @transform_9, window_bounds = array<i64: 2, 16, 16>}, {pipeline_mode = #tpu.pipeline_mode<synchronous>, transform_indices = @transform_10, window_bounds = array<i64: 1, 16>}, {pipeline_mode = #tpu.pipeline_mode<synchronous>, transform_indices = @transform_11, window_bounds = array<i64: 16, 5>}, {pipeline_mode = #tpu.pipeline_mode<synchronous>, transform_indices = @transform_12, window_bounds = array<i64: 1, 5>}, {transform_indices = @transform_13, window_bounds = array<i64: 1, 1, 5>}]} {
    %c0 = arith.constant 0 : index
    %c0_0 = arith.constant 0 : index
    %c0_1 = arith.constant 0 : index
    %0 = vector.load %arg1[%c0, %c0_0, %c0_1] : memref<1x20x60xf32, #tpu.memory_space<vmem>>, vector<1x20x60xf32>
    %1 = vector.shape_cast %0 : vector<1x20x60xf32> to vector<20x60xf32>
    %2 = vector.extract_strided_slice %1 {offsets = [0, 0], sizes = [18, 60], strides = [1, 1]} : vector<20x60xf32> to vector<18x60xf32>
    %c0_2 = arith.constant 0 : index
    %c0_3 = arith.constant 0 : index
    %c0_4 = arith.constant 0 : index
    %3 = vector.load %arg2[%c0_2, %c0_3, %c0_4] : memref<3x60x72xf32, #tpu.memory_space<vmem>>, vector<1x60x72xf32>
    %4 = vector.shape_cast %3 : vector<1x60x72xf32> to vector<60x72xf32>
    %cst = arith.constant dense<0.000000e+00> : vector<18x72xf32>
    %5 = tpu.matmul %2, %4, %cst {dimension_numbers = #tpu.dot_dimension_numbers<[1], [0], [0], [1], [0, 0, 1, 1], [], []>} : vector<18x60xf32>, vector<60x72xf32>, vector<18x72xf32> -> vector<18x72xf32>
    %6 = vector.extract_strided_slice %1 {offsets = [1, 0], sizes = [18, 60], strides = [1, 1]} : vector<20x60xf32> to vector<18x60xf32>
    %c1 = arith.constant 1 : index
    %c0_5 = arith.constant 0 : index
    %c0_6 = arith.constant 0 : index
    %7 = vector.load %arg2[%c1, %c0_5, %c0_6] : memref<3x60x72xf32, #tpu.memory_space<vmem>>, vector<1x60x72xf32>
    %8 = vector.shape_cast %7 : vector<1x60x72xf32> to vector<60x72xf32>
    %cst_7 = arith.constant dense<0.000000e+00> : vector<18x72xf32>
    %9 = tpu.matmul %6, %8, %cst_7 {dimension_numbers = #tpu.dot_dimension_numbers<[1], [0], [0], [1], [0, 0, 1, 1], [], []>} : vector<18x60xf32>, vector<60x72xf32>, vector<18x72xf32> -> vector<18x72xf32>
    %10 = arith.addf %5, %9 : vector<18x72xf32>
    %11 = vector.extract_strided_slice %1 {offsets = [2, 0], sizes = [18, 60], strides = [1, 1]} : vector<20x60xf32> to vector<18x60xf32>
    %c2 = arith.constant 2 : index
    %c0_8 = arith.constant 0 : index
    %c0_9 = arith.constant 0 : index
    %12 = vector.load %arg2[%c2, %c0_8, %c0_9] : memref<3x60x72xf32, #tpu.memory_space<vmem>>, vector<1x60x72xf32>
    %13 = vector.shape_cast %12 : vector<1x60x72xf32> to vector<60x72xf32>
    %cst_10 = arith.constant dense<0.000000e+00> : vector<18x72xf32>
    %14 = tpu.matmul %11, %13, %cst_10 {dimension_numbers = #tpu.dot_dimension_numbers<[1], [0], [0], [1], [0, 0, 1, 1], [], []>} : vector<18x60xf32>, vector<60x72xf32>, vector<18x72xf32> -> vector<18x72xf32>
    %15 = arith.addf %10, %14 : vector<18x72xf32>
    %c0_11 = arith.constant 0 : index
    %c0_12 = arith.constant 0 : index
    %16 = vector.load %arg3[%c0_11, %c0_12] : memref<1x72xf32, #tpu.memory_space<vmem>>, vector<1x72xf32>
    %17 = vector.broadcast %16 : vector<1x72xf32> to vector<18x72xf32>
    %18 = arith.addf %15, %17 : vector<18x72xf32>
    %cst_13 = arith.constant 0.000000e+00 : f32
    %19 = vector.broadcast %cst_13 : f32 to vector<18x72xf32>
    %20 = arith.maximumf %18, %19 : vector<18x72xf32>
    %21 = vector.extract_strided_slice %20 {offsets = [0, 0], sizes = [16, 72], strides = [1, 1]} : vector<18x72xf32> to vector<16x72xf32>
    %22 = vector.extract_strided_slice %20 {offsets = [1, 0], sizes = [16, 72], strides = [1, 1]} : vector<18x72xf32> to vector<16x72xf32>
    %23 = arith.maximumf %21, %22 : vector<16x72xf32>
    %24 = vector.extract_strided_slice %20 {offsets = [2, 0], sizes = [16, 72], strides = [1, 1]} : vector<18x72xf32> to vector<16x72xf32>
    %25 = arith.maximumf %23, %24 : vector<16x72xf32>
    %c0_14 = arith.constant 0 : index
    %c0_15 = arith.constant 0 : index
    %26 = vector.load %arg4[%c0_14, %c0_15] : memref<8x16xf32, #tpu.memory_space<vmem>>, vector<8x16xf32>
    %cst_16 = arith.constant dense<0.000000e+00> : vector<8x72xf32>
    %27 = tpu.matmul %26, %25, %cst_16 {dimension_numbers = #tpu.dot_dimension_numbers<[1], [0], [0], [1], [0, 0, 1, 1], [], []>} : vector<8x16xf32>, vector<16x72xf32>, vector<8x72xf32> -> vector<8x72xf32>
    %c0_17 = arith.constant 0 : index
    %c0_18 = arith.constant 0 : index
    %28 = vector.load %arg5[%c0_17, %c0_18] : memref<72x96xf32, #tpu.memory_space<vmem>>, vector<72x96xf32>
    %cst_19 = arith.constant dense<0.000000e+00> : vector<8x96xf32>
    %29 = tpu.matmul %27, %28, %cst_19 {dimension_numbers = #tpu.dot_dimension_numbers<[1], [0], [0], [1], [0, 0, 1, 1], [], []>} : vector<8x72xf32>, vector<72x96xf32>, vector<8x96xf32> -> vector<8x96xf32>
    %30 = vector.extract_strided_slice %29 {offsets = [0, 0], sizes = [8, 32], strides = [1, 1]} : vector<8x96xf32> to vector<8x32xf32>
    %31 = vector.extract_strided_slice %29 {offsets = [0, 32], sizes = [8, 32], strides = [1, 1]} : vector<8x96xf32> to vector<8x32xf32>
    %32 = arith.maximumf %30, %31 : vector<8x32xf32>
    %33 = vector.extract_strided_slice %29 {offsets = [0, 64], sizes = [8, 32], strides = [1, 1]} : vector<8x96xf32> to vector<8x32xf32>
    %34 = arith.maximumf %32, %33 : vector<8x32xf32>
    %35 = vector.extract_strided_slice %34 {offsets = [0, 0], sizes = [6, 32], strides = [1, 1]} : vector<8x32xf32> to vector<6x32xf32>
    %c0_20 = arith.constant 0 : index
    %c0_21 = arith.constant 0 : index
    %c0_22 = arith.constant 0 : index
    %36 = vector.load %arg6[%c0_20, %c0_21, %c0_22] : memref<3x32x48xf32, #tpu.memory_space<vmem>>, vector<1x32x48xf32>
    %37 = vector.shape_cast %36 : vector<1x32x48xf32> to vector<32x48xf32>
    %cst_23 = arith.constant dense<0.000000e+00> : vector<6x48xf32>
    %38 = tpu.matmul %35, %37, %cst_23 {dimension_numbers = #tpu.dot_dimension_numbers<[1], [0], [0], [1], [0, 0, 1, 1], [], []>} : vector<6x32xf32>, vector<32x48xf32>, vector<6x48xf32> -> vector<6x48xf32>
    %39 = vector.extract_strided_slice %34 {offsets = [1, 0], sizes = [6, 32], strides = [1, 1]} : vector<8x32xf32> to vector<6x32xf32>
    %c1_24 = arith.constant 1 : index
    %c0_25 = arith.constant 0 : index
    %c0_26 = arith.constant 0 : index
    %40 = vector.load %arg6[%c1_24, %c0_25, %c0_26] : memref<3x32x48xf32, #tpu.memory_space<vmem>>, vector<1x32x48xf32>
    %41 = vector.shape_cast %40 : vector<1x32x48xf32> to vector<32x48xf32>
    %cst_27 = arith.constant dense<0.000000e+00> : vector<6x48xf32>
    %42 = tpu.matmul %39, %41, %cst_27 {dimension_numbers = #tpu.dot_dimension_numbers<[1], [0], [0], [1], [0, 0, 1, 1], [], []>} : vector<6x32xf32>, vector<32x48xf32>, vector<6x48xf32> -> vector<6x48xf32>
    %43 = arith.addf %38, %42 : vector<6x48xf32>
    %44 = vector.extract_strided_slice %34 {offsets = [2, 0], sizes = [6, 32], strides = [1, 1]} : vector<8x32xf32> to vector<6x32xf32>
    %c2_28 = arith.constant 2 : index
    %c0_29 = arith.constant 0 : index
    %c0_30 = arith.constant 0 : index
    %45 = vector.load %arg6[%c2_28, %c0_29, %c0_30] : memref<3x32x48xf32, #tpu.memory_space<vmem>>, vector<1x32x48xf32>
    %46 = vector.shape_cast %45 : vector<1x32x48xf32> to vector<32x48xf32>
    %cst_31 = arith.constant dense<0.000000e+00> : vector<6x48xf32>
    %47 = tpu.matmul %44, %46, %cst_31 {dimension_numbers = #tpu.dot_dimension_numbers<[1], [0], [0], [1], [0, 0, 1, 1], [], []>} : vector<6x32xf32>, vector<32x48xf32>, vector<6x48xf32> -> vector<6x48xf32>
    %48 = arith.addf %43, %47 : vector<6x48xf32>
    %c0_32 = arith.constant 0 : index
    %c0_33 = arith.constant 0 : index
    %49 = vector.load %arg7[%c0_32, %c0_33] : memref<1x48xf32, #tpu.memory_space<vmem>>, vector<1x48xf32>
    %50 = vector.broadcast %49 : vector<1x48xf32> to vector<6x48xf32>
    %51 = arith.addf %48, %50 : vector<6x48xf32>
    %cst_34 = arith.constant 0.000000e+00 : f32
    %52 = vector.broadcast %cst_34 : f32 to vector<6x48xf32>
    %53 = arith.maximumf %51, %52 : vector<6x48xf32>
    %54 = vector.extract_strided_slice %53 {offsets = [0, 0], sizes = [4, 48], strides = [1, 1]} : vector<6x48xf32> to vector<4x48xf32>
    %55 = vector.extract_strided_slice %53 {offsets = [1, 0], sizes = [4, 48], strides = [1, 1]} : vector<6x48xf32> to vector<4x48xf32>
    %56 = arith.maximumf %54, %55 : vector<4x48xf32>
    %57 = vector.extract_strided_slice %53 {offsets = [2, 0], sizes = [4, 48], strides = [1, 1]} : vector<6x48xf32> to vector<4x48xf32>
    %58 = arith.maximumf %56, %57 : vector<4x48xf32>
    %c0_35 = arith.constant 0 : index
    %c0_36 = arith.constant 0 : index
    %59 = vector.load %arg8[%c0_35, %c0_36] : memref<2x4xf32, #tpu.memory_space<vmem>>, vector<2x4xf32>
    %cst_37 = arith.constant dense<0.000000e+00> : vector<2x48xf32>
    %60 = tpu.matmul %59, %58, %cst_37 {dimension_numbers = #tpu.dot_dimension_numbers<[1], [0], [0], [1], [0, 0, 1, 1], [], []>} : vector<2x4xf32>, vector<4x48xf32>, vector<2x48xf32> -> vector<2x48xf32>
    %c0_38 = arith.constant 0 : index
    %c0_39 = arith.constant 0 : index
    %61 = vector.load %arg9[%c0_38, %c0_39] : memref<48x48xf32, #tpu.memory_space<vmem>>, vector<48x48xf32>
    %cst_40 = arith.constant dense<0.000000e+00> : vector<2x48xf32>
    %62 = tpu.matmul %60, %61, %cst_40 {dimension_numbers = #tpu.dot_dimension_numbers<[1], [0], [0], [1], [0, 0, 1, 1], [], []>} : vector<2x48xf32>, vector<48x48xf32>, vector<2x48xf32> -> vector<2x48xf32>
    %63 = vector.extract_strided_slice %62 {offsets = [0, 0], sizes = [2, 16], strides = [1, 1]} : vector<2x48xf32> to vector<2x16xf32>
    %64 = vector.extract_strided_slice %62 {offsets = [0, 16], sizes = [2, 16], strides = [1, 1]} : vector<2x48xf32> to vector<2x16xf32>
    %65 = arith.maximumf %63, %64 : vector<2x16xf32>
    %66 = vector.extract_strided_slice %62 {offsets = [0, 32], sizes = [2, 16], strides = [1, 1]} : vector<2x48xf32> to vector<2x16xf32>
    %67 = arith.maximumf %65, %66 : vector<2x16xf32>
    %c0_41 = arith.constant 0 : index
    %c0_42 = arith.constant 0 : index
    %68 = vector.load %arg11[%c0_41, %c0_42] : memref<1x16xf32, #tpu.memory_space<vmem>>, vector<1x16xf32>
    %69 = vector.extract_strided_slice %67 {offsets = [0, 0], sizes = [1, 16], strides = [1, 1]} : vector<2x16xf32> to vector<1x16xf32>
    %c0_43 = arith.constant 0 : index
    %c0_44 = arith.constant 0 : index
    %c0_45 = arith.constant 0 : index
    %70 = vector.load %arg10[%c0_43, %c0_44, %c0_45] : memref<2x16x16xf32, #tpu.memory_space<vmem>>, vector<1x16x16xf32>
    %71 = vector.shape_cast %70 : vector<1x16x16xf32> to vector<16x16xf32>
    %cst_46 = arith.constant dense<0.000000e+00> : vector<1x16xf32>
    %72 = tpu.matmul %69, %71, %cst_46 {dimension_numbers = #tpu.dot_dimension_numbers<[1], [0], [0], [1], [0, 0, 1, 1], [], []>} : vector<1x16xf32>, vector<16x16xf32>, vector<1x16xf32> -> vector<1x16xf32>
    %73 = arith.addf %68, %72 : vector<1x16xf32>
    %74 = vector.extract_strided_slice %67 {offsets = [1, 0], sizes = [1, 16], strides = [1, 1]} : vector<2x16xf32> to vector<1x16xf32>
    %c1_47 = arith.constant 1 : index
    %c0_48 = arith.constant 0 : index
    %c0_49 = arith.constant 0 : index
    %75 = vector.load %arg10[%c1_47, %c0_48, %c0_49] : memref<2x16x16xf32, #tpu.memory_space<vmem>>, vector<1x16x16xf32>
    %76 = vector.shape_cast %75 : vector<1x16x16xf32> to vector<16x16xf32>
    %cst_50 = arith.constant dense<0.000000e+00> : vector<1x16xf32>
    %77 = tpu.matmul %74, %76, %cst_50 {dimension_numbers = #tpu.dot_dimension_numbers<[1], [0], [0], [1], [0, 0, 1, 1], [], []>} : vector<1x16xf32>, vector<16x16xf32>, vector<1x16xf32> -> vector<1x16xf32>
    %78 = arith.addf %73, %77 : vector<1x16xf32>
    %79 = arith.negf %78 : vector<1x16xf32>
    %80 = math.exp %79 : vector<1x16xf32>
    %cst_51 = arith.constant 1.000000e+00 : f32
    %81 = vector.broadcast %cst_51 : f32 to vector<1x16xf32>
    %82 = arith.addf %81, %80 : vector<1x16xf32>
    %83 = arith.divf %81, %82 : vector<1x16xf32>
    %c0_52 = arith.constant 0 : index
    %c0_53 = arith.constant 0 : index
    %84 = vector.load %arg12[%c0_52, %c0_53] : memref<16x5xf32, #tpu.memory_space<vmem>>, vector<16x5xf32>
    %cst_54 = arith.constant dense<0.000000e+00> : vector<1x5xf32>
    %85 = tpu.matmul %83, %84, %cst_54 {dimension_numbers = #tpu.dot_dimension_numbers<[1], [0], [0], [1], [0, 0, 1, 1], [], []>} : vector<1x16xf32>, vector<16x5xf32>, vector<1x5xf32> -> vector<1x5xf32>
    %c0_55 = arith.constant 0 : index
    %c0_56 = arith.constant 0 : index
    %86 = vector.load %arg13[%c0_55, %c0_56] : memref<1x5xf32, #tpu.memory_space<vmem>>, vector<1x5xf32>
    %87 = arith.addf %85, %86 : vector<1x5xf32>
    %c0_57 = arith.constant 0 : index
    %c0_58 = arith.constant 0 : index
    %c0_59 = arith.constant 0 : index
    %88 = vector.load %arg14[%c0_57, %c0_58, %c0_59] : memref<1x1x5xf32, #tpu.memory_space<vmem>>, vector<1x1x5xf32>
    %89 = vector.shape_cast %88 : vector<1x1x5xf32> to vector<1x5xf32>
    %90 = vector.shape_cast %87 : vector<1x5xf32> to vector<1x1x5xf32>
    tpu.vector_store %arg14[%c0_57, %c0_58, %c0_59], %90 {strides = array<i32>} : memref<1x1x5xf32, #tpu.memory_space<vmem>>, vector<1x1x5xf32>,
    return
  }
  func.func @transform_0(%arg0: i32) -> (i32, i32, i32) {
    %c0_i32 = arith.constant 0 : i32
    %c0_i32_0 = arith.constant 0 : i32
    %c0_i32_1 = arith.constant 0 : i32
    return %arg0, %c0_i32, %c0_i32_0 : i32, i32, i32
  }
  func.func @transform_1(%arg0: i32) -> (i32, i32, i32) {
    %c0_i32 = arith.constant 0 : i32
    %c0_i32_0 = arith.constant 0 : i32
    %c0_i32_1 = arith.constant 0 : i32
    %c0_i32_2 = arith.constant 0 : i32
    return %c0_i32, %c0_i32_0, %c0_i32_1 : i32, i32, i32
  }
  func.func @transform_2(%arg0: i32) -> (i32, i32) {
    %c0_i32 = arith.constant 0 : i32
    %c0_i32_0 = arith.constant 0 : i32
    %c0_i32_1 = arith.constant 0 : i32
    return %c0_i32, %c0_i32_0 : i32, i32
  }
  func.func @transform_3(%arg0: i32) -> (i32, i32) {
    %c0_i32 = arith.constant 0 : i32
    %c0_i32_0 = arith.constant 0 : i32
    %c0_i32_1 = arith.constant 0 : i32
    return %c0_i32, %c0_i32_0 : i32, i32
  }
  func.func @transform_4(%arg0: i32) -> (i32, i32) {
    %c0_i32 = arith.constant 0 : i32
    %c0_i32_0 = arith.constant 0 : i32
    %c0_i32_1 = arith.constant 0 : i32
    return %c0_i32, %c0_i32_0 : i32, i32
  }
  func.func @transform_5(%arg0: i32) -> (i32, i32, i32) {
    %c0_i32 = arith.constant 0 : i32
    %c0_i32_0 = arith.constant 0 : i32
    %c0_i32_1 = arith.constant 0 : i32
    %c0_i32_2 = arith.constant 0 : i32
    return %c0_i32, %c0_i32_0, %c0_i32_1 : i32, i32, i32
  }
  func.func @transform_6(%arg0: i32) -> (i32, i32) {
    %c0_i32 = arith.constant 0 : i32
    %c0_i32_0 = arith.constant 0 : i32
    %c0_i32_1 = arith.constant 0 : i32
    return %c0_i32, %c0_i32_0 : i32, i32
  }
  func.func @transform_7(%arg0: i32) -> (i32, i32) {
    %c0_i32 = arith.constant 0 : i32
    %c0_i32_0 = arith.constant 0 : i32
    %c0_i32_1 = arith.constant 0 : i32
    return %c0_i32, %c0_i32_0 : i32, i32
  }
  func.func @transform_8(%arg0: i32) -> (i32, i32) {
    %c0_i32 = arith.constant 0 : i32
    %c0_i32_0 = arith.constant 0 : i32
    %c0_i32_1 = arith.constant 0 : i32
    return %c0_i32, %c0_i32_0 : i32, i32
  }
  func.func @transform_9(%arg0: i32) -> (i32, i32, i32) {
    %c0_i32 = arith.constant 0 : i32
    %c0_i32_0 = arith.constant 0 : i32
    %c0_i32_1 = arith.constant 0 : i32
    %c0_i32_2 = arith.constant 0 : i32
    return %c0_i32, %c0_i32_0, %c0_i32_1 : i32, i32, i32
  }
  func.func @transform_10(%arg0: i32) -> (i32, i32) {
    %c0_i32 = arith.constant 0 : i32
    %c0_i32_0 = arith.constant 0 : i32
    %c0_i32_1 = arith.constant 0 : i32
    return %c0_i32, %c0_i32_0 : i32, i32
  }
  func.func @transform_11(%arg0: i32) -> (i32, i32) {
    %c0_i32 = arith.constant 0 : i32
    %c0_i32_0 = arith.constant 0 : i32
    %c0_i32_1 = arith.constant 0 : i32
    return %c0_i32, %c0_i32_0 : i32, i32
  }
  func.func @transform_12(%arg0: i32) -> (i32, i32) {
    %c0_i32 = arith.constant 0 : i32
    %c0_i32_0 = arith.constant 0 : i32
    %c0_i32_1 = arith.constant 0 : i32
    return %c0_i32, %c0_i32_0 : i32, i32
  }
  func.func @transform_13(%arg0: i32) -> (i32, i32, i32) {
    %c0_i32 = arith.constant 0 : i32
    %c0_i32_0 = arith.constant 0 : i32
    %c0_i32_1 = arith.constant 0 : i32
    return %arg0, %c0_i32, %c0_i32_0 : i32, i32, i32
  }
}

</mosaic_0001>

<bundles_post_ra>
// kernel: _lambda_.1
= control target key start
LH: loop header
LB: loop body
LE: loop exit
PB: predicated region body
PF: predicated region fallthrough
CT: control target
= control target key end

     0   :  { %s2607_s0 = inlined_call_operand.vmem [shape: f32[2,20,60], index: 0, kind: input, shape index: {}]   ;;  %s2608_s1 = inlined_call_operand.vmem [shape: f32[3,60,72], index: 1, kind: input, shape index: {}]   ;;  %s2609_s2 = inlined_call_operand.vmem [shape: f32[1,72], index: 2, kind: input, shape index: {}]   ;;  %s2610_s3 = inlined_call_operand.vmem [shape: f32[8,16], index: 3, kind: input, shape index: {}]   ;;  %s2611_s4 = inlined_call_operand.vmem [shape: f32[72,96], index: 4, kind: input, shape index: {}]   ;;  %s2612_s5 = inlined_call_operand.vmem [shape: f32[3,32,48], index: 5, kind: input, shape index: {}]   ;;  %s2613_s6 = inlined_call_operand.vmem [shape: f32[1,48], index: 6, kind: input, shape index: {}]   ;;  %s2614_s7 = inlined_call_operand.vmem [shape: f32[2,4], index: 7, kind: input, shape index: {}]   ;;  %s2615_s8 = inlined_call_operand.vmem [shape: f32[48,48], index: 8, kind: input, shape index: {}]   ;;  %s2616_s9 = inlined_call_operand.vmem [shape: f32[2,16,16], index: 9, kind: input, shape index: {}]   ;;  %s2617_s10 = inlined_call_operand.vmem [shape: f32[1,16], index: 10, kind: input, shape index: {}]   ;;  %s2618_s11 = inlined_call_operand.vmem [shape: f32[16,5], index: 11, kind: input, shape index: {}]   ;;  %s2619_s12 = inlined_call_operand.vmem [shape: f32[1,5], index: 12, kind: input, shape index: {}]   ;;  %s2620_s13 = inlined_call_operand.hbm [shape: f32[2,1,5], index: 13, kind: output, shape index: {}]  }
   0x1   :  { %2622 = sst [smem:[#allocation7_spill]] %s2607_s0 }
   0x2   :  { %18 = vsyncpa [#allocation3], 0 }
   0x3   :  { %20 = vsyncpa [#allocation3 + $0x1], 0  ;;  %s2182_s25 = smov 0   ;;  %s2184_s26 = smov 0  }
   0x4   :  { %s2186_s27 = smov 0   ;;  %s2188_s28 = smov 0  }
   0x5 LB: > { %2623 = sst [smem:[#allocation5_spill]] %s2100_s27  ;;  %s2203_s29 = sadd.s32 4294967295, %s2104_s28   ;;  %s2104_s28 = sphi %s2188_s28, %s2632_s28   ;;  %s2100_s27 = sphi %s2186_s27, %s2629_s27   ;;  %s2096_s26 = sphi %s2184_s26, %s2631_s26   ;;  %s2092_s25 = sphi %s2182_s25, %s2630_s25  }
   0x6   : > { %s1679_s30 = sadd.s32 4294967294, %s2104_s28   ;;  %s2207_s14 = sadd.s32 1, %s2104_s28  }
   0x7   : > { %s311_s15 = sadd.s32 1, %s2100_s27  ;;  %s308_s16 = ssub.s32 %s2104_s28, %s2207_s14 }
   0x8   : > { %p321_p0 = scmp.ne.s32.totalorder %s2100_s27, %s2096_s26  ;;  %p309_p1 = scmp.eq.s32.totalorder %s308_s16, 0 }
   0x9   : > { %p322_p2 = scmp.eq.s32.totalorder %s2203_s29, 1  ;;  %p327_p3 = scmp.ne.s32.totalorder %s2096_s26, %s2092_s25 }
   0xa   : > { %p328_p4 = scmp.eq.s32.totalorder %s1679_s30, 1  ;;  %p1682_p7 = scmp.ge.s32.totalorder %s2104_s28, 1 }
   0xb   : > { %s2218_s17 = scalar_select %p309_p1, %s2100_s27, %s311_s15  }
   0xc   : > { %p2220_p5 = por %p322_p2, %p321_p0  ;;  %p2224_p6 = por %p328_p4, %p327_p3 }
   0xd   : > { %2624 = sst [smem:[#allocation6_spill]] %s2218_s17  ;;  %p390_p8 = scmp.lt.s32.totalorder %s2104_s28, 3 }
   0xf   : > { %p391_p9 = pnand %p1682_p7, %p390_p8 }
  0x10   : > { %p433_p10 = scmp.lt.s32.totalorder (!%p391_p9), %s2203_s29, 1  ;;  %s2627_s0 = sld [smem:[#allocation7_spill]] (!%p391_p9) }
  0x11   : > { %394 = sbr.rel (%p391_p9) target bundleno = 1944 (0x798), region = 72  ;;  %s2108_s23 = smov (!%p391_p9), 96  }
  0x12   : > { %s2109_s30 = smov (!%p391_p9), 64   ;;  %s431_s16 = sand.u32 (!%p391_p9), 1, %s2096_s26  }
  0x13   : > { %s1736_s21 = sshll.u32 (!%p391_p9), %s2203_s29, 4 }
  0x14   : > { %s2572_s15 = scalar_lea.hbm (!%p391_p9), %s2620_s13, %s1736_s21 }
  0x16   : > { %v1691_v0 = vld [vmem:[%s2608_s1 + $0x78] sm:$0xf]  ;;  %vm474_vm0 = vcmask 1043456   ;;  %v2106_v2 = vmov 0.0   ;;  %v1690_v3 = vld [vmem:[%s2608_s1 + $0x70] sm:$0xff]  ;;  %v1689_v5 = vld [vmem:[%s2608_s1 + $0x68] sm:$0xff] }
  0x17   : > { %v448_v1 = vld [vmem:[%s2608_s1 + $0x38] sm:$0xf]  ;;  %1818 = vmatprep.subr.mxu0 %v2106_v2  ;;  %1843 = vmatprep.subr.mxu1 %v2106_v2  ;;  %v447_v4 = vld [vmem:[%s2608_s1 + $0x30] sm:$0xff]  ;;  %v446_v6 = vld [vmem:[%s2608_s1 + $0x28] sm:$0xff]  ;;  %s434_s24 = scalar_select %p433_p10, %s2203_s29, 1  ;;  %vm461_vm1 = vcmask 1046528  }
  0x18   : > { %1819 = vmatpush3.msk.msra.mxu0 %vm474_vm0, %v1691_v0  ;;  %1844 = vmatpush3.msk.msra.mxu1 %vm474_vm0, %v448_v1  ;;  %v1688_v7 = vld [vmem:[%s2608_s1 + $0x60] sm:$0xff]  ;;  %v1687_v9 = vld [vmem:[%s2608_s1 + $0x58] sm:$0xff]  ;;  %v1686_v13 = vld [vmem:[%s2608_s1 + $0x50] sm:$0xff]  ;;  %vm467_vm2 = vcmask 490496   ;;  %vm2107_vm3 = vmmov 0   ;;  %vm656_vm4 = vcmask 1045504  }
  0x19   : > { %1820 = vmatprep.subr.mxu0 %v2106_v2  ;;  %1845 = vmatprep.subr.mxu1 %v2106_v2  ;;  %v445_v8 = vld [vmem:[%s2608_s1 + $0x20] sm:$0xff]  ;;  %s1995_s20 = smul.u32 24, %s434_s24  ;;  %v444_v10 = vld [vmem:[%s2608_s1 + $0x18] sm:$0xff]  ;;  %v443_v14 = vld [vmem:[%s2608_s1 + $0x10] sm:$0xff]  ;;  %vm789_vm5 = vcmask 130048   ;;  %vm872_vm6 = vcmask 588800  }
  0x1a   : > { %1821 = vmatpush3.msra.mxu0 %v1690_v3  ;;  %1846 = vmatpush3.msra.mxu1 %v447_v4  ;;  %v1685_v17 = vld [vmem:[%s2608_s1 + $0x48] sm:$0xff]  ;;  %v1684_v20 = vld [vmem:[%s2608_s1 + $0x40] sm:$0xff]  ;;  %v1707_v24 = vld [vmem:[%s2608_s1 + $0xb8] sm:$0xf]  ;;  %vm966_vm7 = vcmask 261120   ;;  %vm1207_vm8 = vcmask 31744  }
  0x1b   : > { %1822 = vmatprep.subr.mxu0 %v2106_v2  ;;  %1847 = vmatprep.subr.mxu1 %v2106_v2  ;;  %s437_s17 = scalar_lea.vmem %s2627_s0, %s1995_s20  ;;  %v442_v18 = vld [vmem:[%s2608_s1 + $0x8] sm:$0xff]  ;;  %v441_v22 = vld [vmem:[%s2608_s1] sm:$0xff]  ;;  %v1706_v25 = vld [vmem:[%s2608_s1 + $0xb0] sm:$0xff]  ;;  %vm1290_vm9 = vcmask 392192   ;;  %s2110_s24 = smov 112   ;;  %vm1609_vm10 = vcmask 32768  }
  0x1c   : > { %1823 = vmatpush3.msra.mxu0 %v1689_v5  ;;  %1848 = vmatpush3.msra.mxu1 %v446_v6  ;;  %v2275_v11 = vld [vmem:[%s437_s17] sm:$0xff]  ;;  %v2277_v12 = vld [vmem:[%s437_s17 + $0x8] sm:$0xff]  ;;  %v2297_v19 = vld [vmem:[%s437_s17 + $0x10] sm:$0xf]  ;;  %s2111_s29 = smov [#allocation2]  }
  0x1d   : > { %1824 = vmatprep.subr.mxu0 %v2106_v2  ;;  %1849 = vmatprep.subr.mxu1 %v2106_v2  ;;  %v462_v15 = vrot.slane %v2275_v11, 1  ;;  %v463_v16 = vrot.slane %v2277_v12, 1  ;;  %v465_v23 = vrot.slane %v2297_v19, 1  ;;  %v1705_v27 = vld [vmem:[%s2608_s1 + $0xa8] sm:$0xff]  ;;  %v1704_v28 = vld [vmem:[%s2608_s1 + $0xa0] sm:$0xff]  ;;  %v1703_v29 = vld [vmem:[%s2608_s1 + $0x98] sm:$0xff] }
  0x1e   : > { %1825 = vmatpush3.msra.mxu0 %v1688_v7  ;;  %1850 = vmatpush3.msra.mxu1 %v445_v8  ;;  %v1702_v30 = vld [vmem:[%s2608_s1 + $0x90] sm:$0xff]  ;;  %v657_v31 = vrot.slane %v2275_v11, 2  ;;  %v658_v32 = vrot.slane %v2277_v12, 2  ;;  %v1701_v33 = vld [vmem:[%s2608_s1 + $0x88] sm:$0xff]  ;;  %v1700_v34 = vld [vmem:[%s2608_s1 + $0x80] sm:$0xff]  ;;  %v660_v36 = vrot.slane %v2297_v19, 2 }
  0x1f   : > { %1826 = vmatprep.subr.mxu0 %v2106_v2  ;;  %1851 = vmatprep.subr.mxu1 %v2106_v2  ;;  %v464_v21 = vsel %vm461_vm1, %v462_v15, %v463_v16  ;;  %v466_v26 = vsel %vm461_vm1, %v463_v16, %v465_v23  ;;  %v1712_v53 = vld [vmem:[%s2609_s2] ss:$0 sm:$0xff]  ;;  %s2048_s27 = sshll.u32 %s2111_s29, 4  ;;  %s2049_s27 = int_to_ptr.vmem [resolvable:$false] %s2048_s27 }
  0x20   : > { %1827 = vmatpush3.msra.mxu0 %v1687_v9  ;;  %1852 = vmatpush3.msra.mxu1 %v444_v10  ;;  %v659_v35 = vsel %vm656_vm4, %v657_v31, %v658_v32  ;;  %v661_v37 = vsel %vm656_vm4, %v658_v32, %v660_v36  ;;  %v1718_v32 = vld [vmem:[%s2612_s5 + $0x38] sm:$0xff]  ;;  %s2050_s17 = scalar_lea.vmem %s2049_s27, 32 }
  0x21   : > { %1828 = vmatprep.subr.mxu0 %v2106_v2  ;;  %1853 = vmatprep.subr.mxu1 %v2106_v2 }
  0x22   : > { %1829 = vmatpush3.msra.mxu0 %v1686_v13  ;;  %1854 = vmatpush3.msra.mxu1 %v443_v14 }
  0x23   : > { %1830 = vmatprep.subr.mxu0 %v2106_v2  ;;  %1855 = vmatprep.subr.mxu1 %v2106_v2 }
  0x24   : > { %1831 = vmatpush3.msra.mxu0 %v1685_v17  ;;  %1856 = vmatpush3.msra.mxu1 %v442_v18 }
  0x25   : > { %1832 = vmatprep.subr.mxu0 %v2106_v2  ;;  %1834 = vmatprep.mubr.msk.f32.mxu0 %vm2107_vm3, %v2106_v2 }
  0x26   : > { %1833 = vmatpush3.msra.mxu0 %v1684_v20  ;;  %1857 = vmatprep.subr.mxu1 %v2106_v2  ;;  %v788_v20 = vld [vmem:[%s2610_s3] sm:$0xff] }
  0x27   : > { %1835 = vmatmul.mubr.msk.f32.vlgmr.msra.gmra.mxu0 %vm467_vm2, %v464_v21  ;;  %1858 = vmatpush3.msra.mxu1 %v441_v22  ;;  %v871_v21 = vld [vmem:[%s2611_s4 + $0x40] sm:$0xff]  ;;  %v870_v22 = vld [vmem:[%s2611_s4 + $0x38] sm:$0xff] }
  0x28   : > { %1859 = vmatprep.mubr.msk.f32.mxu1 %vm2107_vm3, %v2106_v2  ;;  %1868 = vmatprep.subr.mxu0 %v2106_v2 }
  0x29   : > { %1860 = vmatmul.mubr.msk.f32.vlgmr.msra.gmra.mxu1 %vm467_vm2, %v2275_v11  ;;  %1869 = vmatpush3.msk.msra.mxu0 %vm474_vm0, %v1707_v24  ;;  %v868_v24 = vld [vmem:[%s2611_s4 + $0x28] sm:$0xff] }
  0x2a   : > { %1870 = vmatprep.subr.mxu0 %v2106_v2  ;;  %1837 = vmatprep.mubr.msk.f32.mxu0 %vm2107_vm3, %v2106_v2 }
  0x2b   : > { %1871 = vmatpush3.msra.mxu0 %v1706_v25  ;;  %1862 = vmatprep.mubr.msk.f32.mxu1 %vm2107_vm3, %v2106_v2  ;;  %v867_v25 = vld [vmem:[%s2611_s4 + $0x20] sm:$0xff] }
  0x2c   : > { %1872 = vmatprep.subr.mxu0 %v2106_v2  ;;  %1838 = vmatmul.mubr.msk.f32.gmra.mxu0 %vm467_vm2, %v466_v26  ;;  %v866_v26 = vld [vmem:[%s2611_s4 + $0x18] sm:$0xff] }
  0x2d   : > { %1873 = vmatpush3.msra.mxu0 %v1705_v27  ;;  %1863 = vmatmul.mubr.msk.f32.gmra.mxu1 %vm467_vm2, %v2277_v12  ;;  %v865_v27 = vld [vmem:[%s2611_s4 + $0x10] sm:$0xff] }
  0x2e   : > { %1874 = vmatprep.subr.mxu0 %v2106_v2  ;;  %1840 = vmatprep.mubr.msk.f32.mxu0 %vm2107_vm3, %v2106_v2 }
  0x2f   : > { %1875 = vmatpush3.msra.mxu0 %v1704_v28  ;;  %1865 = vmatprep.mubr.msk.f32.mxu1 %vm2107_vm3, %v2106_v2  ;;  %v864_v28 = vld [vmem:[%s2611_s4 + $0x8] sm:$0xff] }
  0x30   : > { %1876 = vmatprep.subr.mxu0 %v2106_v2  ;;  %1841 = vmatmul.mubr.msk.f32.gmra.mxu0 %vm467_vm2, %v465_v23  ;;  %v869_v23 = vld [vmem:[%s2611_s4 + $0x30] sm:$0xff] }
  0x31   : > { %1877 = vmatpush3.msra.mxu0 %v1703_v29  ;;  %1866 = vmatmul.mubr.msk.f32.gmra.mxu1 %vm467_vm2, %v2297_v19  ;;  %v863_v29 = vld [vmem:[%s2611_s4] sm:$0xff] }
  0x32   : > { %1878 = vmatprep.subr.mxu0 %v2106_v2  ;;  %1884 = vmatprep.mubr.msk.f32.mxu0 %vm2107_vm3, %v2106_v2 }
  0x33   : > { %1879 = vmatpush3.msra.mxu0 %v1702_v30  ;;  %1893 = vmatprep.subr.mxu1 %v2106_v2 }
  0x34   : > { %1880 = vmatprep.subr.mxu0 %v2106_v2  ;;  %1897 = vmatprep.mubr.msk.f32.mxu1 %vm2107_vm3, %v2106_v2 }
  0x35   : > { %1881 = vmatpush3.msra.mxu0 %v1701_v33  ;;  %v1724_v33 = vld [vmem:[%s2612_s5 + $0x58] sm:$0xff] }
  0x36   : > { %1882 = vmatprep.subr.mxu0 %v2106_v2 }
  0x37   : > { %1883 = vmatpush3.msra.mxu0 %v1700_v34  ;;  %v1717_v34 = vld [vmem:[%s2612_s5 + $0x30] sm:$0xff] }
  0x38   : > { %1885 = vmatmul.mubr.msk.f32.vlgmr.msra.gmra.mxu0 %vm467_vm2, %v659_v35  ;;  %1921 = vmatprep.subr.mxu0 %v2106_v2  ;;  %v1723_v35 = vld [vmem:[%s2612_s5 + $0x50] sm:$0xff] }
  0x39   : > { %1887 = vmatprep.mubr.msk.f32.mxu0 %vm2107_vm3, %v2106_v2  ;;  %1922 = vmatpush3.msra.mxu0 %v1718_v32 }
  0x3a   : > { %1923 = vmatprep.subr.mxu0 %v2106_v2 }
  0x3b   : > { %1924 = vmatpush3.msra.mxu0 %v1717_v34 }
  0x3c   : > { %1888 = vmatmul.mubr.msk.f32.gmra.mxu0 %vm467_vm2, %v661_v37  ;;  %1925 = vmatprep.subr.mxu0 %v2106_v2  ;;  %v1722_v37 = vld [vmem:[%s2612_s5 + $0x48] sm:$0xff] }
  0x3d   : > { %1890 = vmatprep.mubr.msk.f32.mxu0 %vm2107_vm3, %v2106_v2 }
  0x40   : > { %1891 = vmatmul.mubr.msk.f32.gmra.mxu0 %vm467_vm2, %v660_v36  ;;  %v1716_v36 = vld [vmem:[%s2612_s5 + $0x28] sm:$0xff] }
  0x41   : > { %1929 = vmatprep.mubr.msk.f32.mxu0 %vm2107_vm3, %v2106_v2  ;;  %1926 = vmatpush3.msra.mxu0 %v1716_v36 }
  0x42   : > { %1927 = vmatprep.subr.mxu0 %v2106_v2 }
  0xe7   : > { %v544_v38 = vpop.f32.mrf.mxu0 }
  0xe9   : > { %v633_v39 = vpop.f32.mrf.mxu1  ;;  %v1836_v40 = vpop.f32.mrf.mxu0 }
  0xea   : > { %v634_v50 = vadd.f32 %v633_v39, %v544_v38  ;;  %v1715_v38 = vld [vmem:[%s2612_s5 + $0x20] sm:$0xff] }
  0xeb   : > { %v1861_v41 = vpop.f32.mrf.mxu1  ;;  %1928 = vmatpush3.msra.mxu0 %v1715_v38  ;;  %v1721_v39 = vld [vmem:[%s2612_s5 + $0x40] sm:$0xff] }
  0xec   : > { %v549_v42 = vpop.f32.mrf.mxu0  ;;  %1932 = vmatprep.subr.mxu0 %v2106_v2 }
  0xed   : > { %v638_v43 = vpop.f32.mrf.mxu1 }
  0xee   : > { %v1839_v44 = vpop.f32.mrf.mxu0  ;;  %v639_v55 = vadd.f32 %v638_v43, %v549_v42 }
  0xef   : > { %v1864_v45 = vpop.f32.mrf.mxu1 }
  0xf0   : > { %v554_v46 = vpop.f32.mrf.mxu0 }
  0xf1   : > { %v643_v47 = vpop.f32.mrf.mxu1 }
  0xf2   : > { %v1842_v48 = vpop.f32.mrf.mxu0  ;;  %v644_v60 = vadd.f32 %v643_v47, %v554_v46 }
  0xf3   : > { %v1867_v49 = vpop.f32.mrf.mxu1  ;;  %v958_v48 = vld [vmem:[%s2612_s5 + $0x18] sm:$0xff] }
  0xf4   : > { %v957_v49 = vld [vmem:[%s2612_s5 + $0x10] sm:$0xff] }
  0xf8   : > { %v737_v51 = vpop.f32.mrf.mxu0 }
  0xf9   : > { %v751_v52 = vadd.f32 %v737_v51, %v634_v50  ;;  %v956_v50 = vld [vmem:[%s2612_s5 + $0x8] sm:$0xff]  ;;  %v955_v51 = vld [vmem:[%s2612_s5] sm:$0xff] }
  0xfa   : > { %v1886_v54 = vpop.f32.mrf.mxu0 }
  0xfb   : > { %v761_v57 = vadd.f32 %v1712_v53, %v751_v52  ;;  %v1289_v52 = vld [vmem:[%s2615_s8 + $0x28] sm:$0xff]  ;;  %v1287_v54 = vld [vmem:[%s2615_s8 + $0x18] sm:$0xff] }
  0xfc   : > { %v742_v56 = vpop.f32.mrf.mxu0 }
  0xfd   : > { %v752_v58 = vadd.f32 %v742_v56, %v639_v55  ;;  %v764_v63 = vmax.f32 %v761_v57, 0.0  ;;  %v1286_v55 = vld [vmem:[%s2615_s8 + $0x10] sm:$0xff]  ;;  %v1285_v56 = vld [vmem:[%s2615_s8 + $0x8] sm:$0xff] }
  0xfe   : > { %v1889_v59 = vpop.f32.mrf.mxu0 }
  0xff   : > { %v762_v61 = vadd.f32 %v1712_v53, %v752_v58  ;;  %v770_v6 = vrot.slane %v764_v63, 1  ;;  %v779_v15 = vrot.slane %v764_v63, 2 }
 0x100   : > { %v747_v62 = vpop.f32.mrf.mxu0 }
 0x101   : > { %v765_v0 = vmax.f32 %v762_v61, 0.0  ;;  %v753_v1 = vadd.f32 %v747_v62, %v644_v60 }
 0x102   : > { %v1892_v3 = vpop.f32.mrf.mxu0 }
 0x103   : > { %v771_v4 = vrot.slane %v765_v0, 1  ;;  %v763_v5 = vadd.f32 %v1712_v53, %v753_v1  ;;  %v780_v11 = vrot.slane %v765_v0, 2  ;;  %v1288_v53 = vld [vmem:[%s2615_s8 + $0x20] sm:$0xff] }
 0x105   : > { %v766_v7 = vmax.f32 %v763_v5, 0.0  ;;  %v772_v10 = vsel %vm461_vm1, %v770_v6, %v771_v4  ;;  %v781_v18 = vsel %vm656_vm4, %v779_v15, %v780_v11 }
 0x106   : > { %v777_v14 = vmax.f32 %v764_v63, %v772_v10  ;;  %v1726_v63 = vld [vmem:[%s2613_s6] ss:$0 sm:$0xff] }
 0x107   : > { %v773_v8 = vrot.slane %v766_v7, 1  ;;  %v782_v9 = vrot.slane %v766_v7, 2  ;;  %v1284_v10 = vld [vmem:[%s2615_s8] sm:$0xff] }
 0x108   : > { %v786_v19 = vmax.f32 %v777_v14, %v781_v18  ;;  %v1374_v14 = vld [vmem:[%s2616_s9] sm:$0xff] }
 0x109   : > { %v774_v12 = vsel %vm461_vm1, %v771_v4, %v773_v8  ;;  %v783_v16 = vsel %vm656_vm4, %v780_v11, %v782_v9  ;;  %v1206_v9 = vld [vmem:[%s2614_s7] sm:$0x3] }
 0x10a   : > { %v778_v13 = vmax.f32 %v765_v0, %v774_v12 }
 0x10c   : > { %v787_v17 = vmax.f32 %v778_v13, %v783_v16  ;;  %v1375_v13 = vld [vmem:[%s2616_s9 + $0x8] sm:$0xff] }
 0x10e   : > { %1894 = vmatpush3.msra.mxu1 %v787_v17 }
 0x10f   : > { %1895 = vmatprep.subr.mxu1 %v2106_v2 }
 0x110   : > { %1896 = vmatpush3.msra.mxu1 %v786_v19 }
 0x111   : > { %1898 = vmatmul.mubr.msk.f32.vlgmr.msra.gmra.mxu1 %vm789_vm5, %v788_v20  ;;  %1900 = vmatprep.subr.mxu1 %v2106_v2 }
 0x112   : > { %1901 = vmatpush3.msra.mxu1 %v871_v21  ;;  %1918 = vmatprep.mubr.msk.f32.mxu1 %vm2107_vm3, %v2106_v2  ;;  %v1732_v21 = vld [vmem:[%s2616_s9 + $0x18] sm:$0xff] }
 0x113   : > { %1902 = vmatprep.subr.mxu1 %v2106_v2 }
 0x114   : > { %1903 = vmatpush3.msra.mxu1 %v870_v22  ;;  %v1731_v22 = vld [vmem:[%s2616_s9 + $0x10] sm:$0xff] }
 0x115   : > { %1904 = vmatprep.subr.mxu1 %v2106_v2 }
 0x116   : > { %1905 = vmatpush3.msra.mxu1 %v869_v23 }
 0x117   : > { %1906 = vmatprep.subr.mxu1 %v2106_v2 }
 0x118   : > { %1907 = vmatpush3.msra.mxu1 %v868_v24  ;;  %v1534_v24 = vld [vmem:[%s2618_s11 + $0x8] sm:$0xff] }
 0x119   : > { %1908 = vmatprep.subr.mxu1 %v2106_v2 }
 0x11a   : > { %1909 = vmatpush3.msra.mxu1 %v867_v25  ;;  %v1533_v25 = vld [vmem:[%s2618_s11] sm:$0xff] }
 0x11b   : > { %1910 = vmatprep.subr.mxu1 %v2106_v2 }
 0x11c   : > { %1911 = vmatpush3.msra.mxu1 %v866_v26  ;;  %v1373_v26 = vld [vmem:[%s2617_s10] sm:$0x1] }
 0x11d   : > { %1912 = vmatprep.subr.mxu1 %v2106_v2 }
 0x11e   : > { %1913 = vmatpush3.msra.mxu1 %v865_v27 }
 0x11f   : > { %1914 = vmatprep.subr.mxu1 %v2106_v2 }
 0x120   : > { %1915 = vmatpush3.msra.mxu1 %v864_v28 }
 0x121   : > { %1916 = vmatprep.subr.mxu1 %v2106_v2 }
 0x122   : > { %1917 = vmatpush3.msra.mxu1 %v863_v29 }
 0x123   : > { %1943 = vmatprep.subr.mxu1 %v2106_v2 }
 0x1d1   : > { %v859_v30 = vpop.f32.mrf.mxu1 }
 0x1d2   : > { %1919 = vmatmul.mubr.msk.f32.vlgmr.msra.gmra.mxu1 %vm872_vm6, %v859_v30 }
 0x1d3   : > { %v1899_v31 = vpop.f32.mrf.mxu1  ;;  %1951 = vmatprep.mubr.msk.f32.mxu1 %vm2107_vm3, %v2106_v2  ;;  %1944 = vmatpush3.msra.mxu1 %v1724_v33 }
 0x1d4   : > { %1945 = vmatprep.subr.mxu1 %v2106_v2 }
 0x1d5   : > { %1946 = vmatpush3.msra.mxu1 %v1723_v35 }
 0x1d6   : > { %1947 = vmatprep.subr.mxu1 %v2106_v2 }
 0x1d7   : > { %1948 = vmatpush3.msra.mxu1 %v1722_v37 }
 0x1d8   : > { %1949 = vmatprep.subr.mxu1 %v2106_v2 }
 0x1d9   : > { %1950 = vmatpush3.msra.mxu1 %v1721_v39 }
 0x1da   : > { %1959 = vmatprep.subr.mxu1 %v2106_v2 }
 0x292   : > { %v942_v40 = vpop.f32.mrf.mxu1 }
 0x293   : > { %947 = vrot.lane.b32.xlu0 %v942_v40, %s2108_s23 }
 0x294   : > { %v1920_v41 = vpop.f32.mrf.mxu1 }
 0x297   : > { %951 = vrot.lane.b32.xlu0 %v942_v40, %s2109_s30 }
 0x305   : > { %v948_v42 = vpop.permute.xlu0 %947 }
 0x306   : > { %v950_v43 = vmax.f32 %v942_v40, %v948_v42 }
 0x309   : > { %v952_v44 = vpop.permute.xlu0 %951 }
 0x30a   : > { %v954_v45 = vmax.f32 %v950_v43, %v952_v44 }
 0x30c   : > { %v965_v46 = vrot.slane %v954_v45, 1  ;;  %v1116_v47 = vrot.slane %v954_v45, 2 }
 0x30e   : > { %1930 = vmatmul.mubr.msk.f32.vlgmr.msra.gmra.mxu0 %vm966_vm7, %v965_v46  ;;  %1952 = vmatmul.mubr.msk.f32.vlgmr.msra.gmra.mxu1 %vm966_vm7, %v1116_v47 }
 0x30f   : > { %1933 = vmatpush3.msra.mxu0 %v958_v48  ;;  %1940 = vmatprep.mubr.msk.f32.mxu0 %vm2107_vm3, %v2106_v2 }
 0x310   : > { %1934 = vmatprep.subr.mxu0 %v2106_v2  ;;  %1971 = vmatprep.mubr.msk.f32.mxu1 %vm2107_vm3, %v2106_v2 }
 0x311   : > { %1935 = vmatpush3.msra.mxu0 %v957_v49  ;;  %1960 = vmatpush3.msra.mxu1 %v1289_v52 }
 0x312   : > { %1936 = vmatprep.subr.mxu0 %v2106_v2  ;;  %1961 = vmatprep.subr.mxu1 %v2106_v2 }
 0x313   : > { %1937 = vmatpush3.msra.mxu0 %v956_v50  ;;  %1962 = vmatpush3.msra.mxu1 %v1288_v53 }
 0x314   : > { %1938 = vmatprep.subr.mxu0 %v2106_v2  ;;  %1963 = vmatprep.subr.mxu1 %v2106_v2 }
 0x315   : > { %1939 = vmatpush3.msra.mxu0 %v955_v51  ;;  %1964 = vmatpush3.msra.mxu1 %v1287_v54 }
 0x316   : > { %1941 = vmatmul.mubr.msk.f32.vlgmr.msra.gmra.mxu0 %vm966_vm7, %v954_v45  ;;  %1954 = vmatprep.subr.mxu0 %v2106_v2 }
 0x317   : > { %1956 = vmatprep.mubr.msk.f32.mxu0 %vm2107_vm3, %v2106_v2  ;;  %1965 = vmatprep.subr.mxu1 %v2106_v2 }
 0x318   : > { %1966 = vmatpush3.msra.mxu1 %v1286_v55 }
 0x319   : > { %1967 = vmatprep.subr.mxu1 %v2106_v2 }
 0x31a   : > { %1968 = vmatpush3.msra.mxu1 %v1285_v56 }
 0x31b   : > { %1969 = vmatprep.subr.mxu1 %v2106_v2 }
 0x31c   : > { %1970 = vmatpush3.msra.mxu1 %v1284_v10 }
 0x3ce   : > { %v1035_v57 = vpop.f32.mrf.mxu0  ;;  %v1185_v58 = vpop.f32.mrf.mxu1 }
 0x3d0   : > { %v1931_v59 = vpop.f32.mrf.mxu0  ;;  %v1953_v60 = vpop.f32.mrf.mxu1 }
 0x3d6   : > { %v1107_v61 = vpop.f32.mrf.mxu0 }
 0x3d7   : > { %v1108_v62 = vadd.f32 %v1107_v61, %v1035_v57 }
 0x3d8   : > { %v1942_v0 = vpop.f32.mrf.mxu0 }
 0x3d9   : > { %v1189_v1 = vadd.f32 %v1185_v58, %v1108_v62 }
 0x3db   : > { %v1197_v3 = vadd.f32 %v1726_v63, %v1189_v1 }
 0x3dd   : > { %v1198_v4 = vmax.f32 %v1197_v3, 0.0 }
 0x3df   : > { %v1200_v5 = vrot.slane %v1198_v4, 1  ;;  %v1203_v7 = vrot.slane %v1198_v4, 2 }
 0x3e1   : > { %v1202_v6 = vmax.f32 %v1198_v4, %v1200_v5 }
 0x3e3   : > { %v1205_v8 = vmax.f32 %v1202_v6, %v1203_v7 }
 0x3e5   : > { %1955 = vmatpush3.msk.msra.mxu0 %vm474_vm0, %v1205_v8 }
 0x3e6   : > { %1957 = vmatmul.mubr.msk.f32.vlgmr.msra.gmra.mxu0 %vm1207_vm8, %v1206_v9  ;;  %1974 = vmatprep.subr.mxu0 %v2106_v2 }
 0x3e7   : > { %1978 = vmatprep.mubr.msk.f32.mxu0 %vm2107_vm3, %v2106_v2  ;;  %1975 = vmatpush3.msra.mxu0 %v1375_v13 }
 0x3e8   : > { %1976 = vmatprep.subr.mxu0 %v2106_v2 }
 0x3e9   : > { %1977 = vmatpush3.msra.mxu0 %v1374_v14 }
 0x3ea   : > { %1981 = vmatprep.subr.mxu0 %v2106_v2 }
 0x4a6   : > { %v1280_v11 = vpop.f32.mrf.mxu0 }
 0x4a7   : > { %1972 = vmatmul.mubr.msk.f32.vlgmr.msra.gmra.mxu1 %vm1290_vm9, %v1280_v11 }
 0x4a8   : > { %v1958_v12 = vpop.f32.mrf.mxu0 }
 0x567   : > { %v1360_v15 = vpop.f32.mrf.mxu1 }
 0x568   : > { %1365 = vrot.lane.b32.xlu1 %v1360_v15, %s2110_s24  ;;  %s1612_s24 = scalar_lea.sflag [#allocation3], %s431_s16 }
 0x569   : > { %v1973_v16 = vpop.f32.mrf.mxu1 }
 0x56c   : > { %1369 = vrot.lane.b32.xlu1 %v1360_v15, %s2108_s23  ;;  %s432_s23 = scalar_lea.vmem [#allocation2], %s431_s16 }
 0x56d   : > { %s1624_s20 = sshll.u32 %s432_s23, 4  ;;  %s1625_s20 = int_to_ptr.vmem [resolvable:$true] %s1624_s20 }
 0x56e   : > { %s2044_s0 = scalar_lea.vmem %s1625_s20, 16  ;;  %p2051_p0 = scmp.lt.s32.totalorder %s1625_s20, %s2049_s27 }
 0x56f   : > { %p2045_p11 = scmp.ne.s32.totalorder %s1625_s20, %s2044_s0  ;;  %p2052_p1 = scmp.lt.s32.totalorder %s2050_s17, %s2044_s0 }
 0x571   : > { %p2046_p12 = pnand %p2045_p11, %p2220_p5  ;;  %p2053_p2 = por %p2052_p1, %p2051_p0 }
 0x573   : > { %p2047_p13 = pneg %p2046_p12 }
 0x575   : > { %p2054_p3 = pnand %p2053_p2, %p2047_p13 }
 0x5da   : > { %v1366_v17 = vpop.permute.xlu1 %1365 }
 0x5db   : > { %v1368_v18 = vmax.f32 %v1360_v15, %v1366_v17 }
 0x5de   : > { %v1370_v19 = vpop.permute.xlu1 %1369 }
 0x5df   : > { %v1372_v20 = vmax.f32 %v1368_v18, %v1370_v19 }
 0x5e1   : > { %1979 = vmatmul.mubr.msk.f32.vlgmr.msra.gmra.mxu0 %vm789_vm5, %v1372_v20  ;;  %v1453_v23 = vrot.slane %v1372_v20, 1 }
 0x5e2   : > { %1982 = vmatpush3.msra.mxu0 %v1732_v21  ;;  %1985 = vmatprep.mubr.msk.f32.mxu0 %vm2107_vm3, %v2106_v2 }
 0x5e3   : > { %1983 = vmatprep.subr.mxu0 %v2106_v2 }
 0x5e4   : > { %1984 = vmatpush3.msra.mxu0 %v1731_v22 }
 0x5e5   : > { %1986 = vmatmul.mubr.msk.f32.vlgmr.msra.gmra.mxu0 %vm789_vm5, %v1453_v23  ;;  %1988 = vmatprep.subr.mxu0 %v2106_v2 }
 0x5e6   : > { %1992 = vmatprep.mubr.msk.f32.mxu0 %vm2107_vm3, %v2106_v2  ;;  %1989 = vmatpush3.msra.mxu0 %v1534_v24 }
 0x5e7   : > { %1990 = vmatprep.subr.mxu0 %v2106_v2  ;;  %v1535_v2 = vld [vmem:[%s2619_s12] sm:$0x1] }
 0x5e8   : > { %1991 = vmatpush3.msra.mxu0 %v1533_v25 }
 0x6a1   : > { %v1445_v27 = vpop.f32.mrf.mxu0 }
 0x6a2   : > { %v1449_v29 = vadd.f32 %v1445_v27, %v1373_v26 }
 0x6a3   : > { %v1980_v28 = vpop.f32.mrf.mxu0 }
 0x6a5   : > { %v1522_v30 = vpop.f32.mrf.mxu0 }
 0x6a6   : > { %v1526_v31 = vadd.f32 %v1522_v30, %v1449_v29 }
 0x6a7   : > { %v1987_v32 = vpop.f32.mrf.mxu0 }
 0x6a8   : > { %v1734_v33 = vmul.f32 -1.442695, %v1526_v31 }
 0x6aa   : > { %2040 = vpow2.f32 %v1734_v33 }
 0x6b7   : > { %v2041_v34 = vpop.eup %2040 }
 0x6b8   : > { %v1530_v35 = vadd.f32 1.0, %v2041_v34 }
 0x6ba   : > { %2042 = vrcp.f32 %v1530_v35 }
 0x6c7   : > { %v2043_v36 = vpop.eup %2042 }
 0x6c8   : > { %1993 = vmatmul.mubr.msk.f32.vlgmr.msra.gmra.mxu0 %vm789_vm5, %v2043_v36 }
 0x788   : > { %v1605_v37 = vpop.f32.mrf.mxu0 }
 0x789   : > { %v1606_v38 = vadd.f32 %v1605_v37, %v1535_v2 }
 0x78a   : > { %v1994_v39 = vpop.f32.mrf.mxu0 }
 0x78b   : > { %1610 = vst.msk [vmem:[%s432_s23] sm:$0x1] %vm1609_vm10, %v1606_v38 }
 0x78c   : > { %2057 = shalt.err (!%p2054_p3)
}
 0x78d   : > { %s2058_s21 = scalar_lea.hbm %s2572_s15, 16  ;;  %s2062_s22 = scalar_lea.hbm %s2620_s13, 32 }
 0x78e   : > { %p2059_p4 = scmp.ne.s32.totalorder %s2572_s15, %s2058_s21  ;;  %p2063_p9 = scmp.lt.s32.totalorder %s2572_s15, %s2620_s13 }
 0x78f   : > { %p2064_p10 = scmp.lt.s32.totalorder %s2062_s22, %s2058_s21 }
 0x790   : > { %p2060_p7 = pnand %p2059_p4, %p2220_p5 }
 0x791   : > { %p2065_p11 = por %p2064_p10, %p2063_p9 }
 0x792   : > { %p2061_p8 = pneg %p2060_p7 }
 0x794   : > { %p2066_p12 = pnand %p2065_p11, %p2061_p8 }
 0x796   : > { %2069 = shalt.err (!%p2066_p12)
}
 0x797   : > { %1996 = dma.vmem_to_hbm [thread:$0]  (%p2220_p5), %s1625_s20, 16, %s2572_s15, %s1612_s24  }
 0x798 PF: > { %p2002_p13 = scmp.ge.s32.totalorder %s2104_s28, 2  ;;  %s1636_s0 = sand.u32 1, %s2092_s25  }
 0x799   : > { %s1637_s27 = scalar_lea.sflag [#allocation3], %s1636_s0 }
 0x79a   : > { %p1999_p0 = pnand %p2002_p13, %p2224_p6 }
 0x79c   : > { %p2000_p1 = pneg %p1999_p0 }
 0x79e   : > { %2087 = dma.done.wait (%p2000_p1), %s1637_s27, 16  }
 0x79f   : > { %2089 = vsyncadd (%p2000_p1), %s1637_s27, 4294967280  ;;  %s2628_s17 = sld [smem:[#allocation5_spill]]  ;;  %p23_p2 = scmp.ge.s32.totalorder %s2207_s14, 4  }
 0x7a0   : > { %s2629_s27 = sld [smem:[#allocation6_spill]]  ;;  %s2630_s25 = smov %s2096_s26 }
 0x7a1   : > { %s2632_s28 = smov %s2207_s14  ;;  %25 = sbr.rel (!%p23_p2) target bundleno = 5 (0x5), region = 112 }
 0x7a5   : > { %s2631_s26 = smov %s2628_s17 }
 0x7a6   :  { %1641 = vsyncpa [#allocation3], 1 }
 0x7a7   :  { %1643 = vsyncpa [#allocation3 + $0x1], 1 }

</bundles_post_ra>
